<compile_context>
chip_gen: v6e
topology: v6e:2x2x1
jax: 0.10.0
libtpu: 0.0.40
codegen_flags: <defaults>
</compile_context>

<pallas_src>
import math

import jax
import jax.numpy as jnp
from jax import lax
from jax.experimental import pallas as pl
from jax.experimental.pallas import tpu as pltpu


def _round_up(v, m):
    return ((v + m - 1) // m) * m


def _linear_kernel(x_ref, w_ref, b_ref, o_ref):
    # x_ref: [bm, K], w_ref: [N_pad, K], b_ref: [1, N_pad], o_ref: [bm, N_pad]
    # MXU matmul with the transposed contraction done in-kernel (no wrapper .T),
    # f32 accumulation, bias broadcast-add on the VPU.
    acc = lax.dot_general(
        x_ref[...], w_ref[...],
        dimension_numbers=(((1,), (1,)), ((), ())),
        preferred_element_type=jnp.float32,
    )
    o_ref[...] = (acc + b_ref[...]).astype(o_ref.dtype)


def net_forward(x, weight, bias, *, block_m=512):
    """x: [B, n_feature] f32, weight: [n_class, n_feature] f32, bias: [n_class] f32."""
    B, K = x.shape
    N = weight.shape[0]

    # Lane-dense output: pad the class dim to a multiple of 128.
    n_pad = _round_up(max(N, 128), 128)
    # Batch tile: multiple of 8 (sublane), capped for VMEM (v7x: 64 MiB phys).
    bm = min(block_m, _round_up(B, 8))
    b_pad = _round_up(B, bm)

    if b_pad != B:
        x = jnp.pad(x, ((0, b_pad - B), (0, 0)))
    w = weight if n_pad == N else jnp.pad(weight, ((0, n_pad - N), (0, 0)))
    b2 = jnp.pad(bias, (0, n_pad - N)).reshape(1, n_pad)

    grid = (b_pad // bm,)

    out = pl.pallas_call(
        _linear_kernel,
        out_shape=jax.ShapeDtypeStruct((b_pad, n_pad), x.dtype),
        grid_spec=pl.GridSpec(
            grid=grid,
            in_specs=[
                pl.BlockSpec((bm, K), lambda i: (i, 0)),       # streamed per step
                pl.BlockSpec((n_pad, K), lambda i: (0, 0)),    # resident weight
                pl.BlockSpec((1, n_pad), lambda i: (0, 0)),    # resident bias row
            ],
            out_specs=pl.BlockSpec((bm, n_pad), lambda i: (i, 0)),
        ),
        compiler_params=pltpu.CompilerParams(
            dimension_semantics=("parallel",),
        ),
        cost_estimate=pl.CostEstimate(
            flops=2 * b_pad * K * n_pad,
            transcendentals=0,
            bytes_accessed=4 * (b_pad * K + n_pad * K + b_pad * n_pad),
        ),
    )(x, w, b2)

    return out[:B, :N]


def init_params(key, n_feature, n_class):
    # torch.nn.init.kaiming_uniform_(w) with default a=0:
    #   bound = sqrt(6 / fan_in), fan_in = n_feature
    bound = math.sqrt(6.0 / n_feature)
    weight = jax.random.uniform(
        key, (n_class, n_feature), jnp.float32, minval=-bound, maxval=bound)
    bias = jnp.full((n_class,), 0.1, dtype=jnp.float32)   # constant_(bias, 0.1)
    return weight, bias


if __name__ == "__main__":
    key = jax.random.PRNGKey(0)
    k_w, k_x = jax.random.split(key)

    batch, n_feature, n_class = 8, 32, 16
    weight, bias = init_params(k_w, n_feature, n_class)
    x = jax.random.normal(k_x, (batch, n_feature), dtype=jnp.float32)

    out = net_forward(x, weight, bias)
    out = jax.block_until_ready(out)

    # reference check in plain JAX
    ref = x @ weight.T + bias
    assert out.shape == (batch, n_class)
    assert jnp.allclose(out, ref, atol=1e-5, rtol=1e-5)

    print("KERNEL_OK")
</pallas_src>

<mosaic_0001>
module attributes {stable_mosaic.version = 11 : i64} {
  func.func @_linear_kernel(%arg0: i32, %arg1: memref<8x32xf32, #tpu.memory_space<vmem>>, %arg2: memref<128x32xf32, #tpu.memory_space<vmem>>, %arg3: memref<1x128xf32, #tpu.memory_space<vmem>>, %arg4: memref<8x128xf32, #tpu.memory_space<vmem>>) attributes {dimension_semantics = [#tpu.dimension_semantics<parallel>], iteration_bounds = array<i64: 1>, scalar_prefetch = 0 : i64, scratch_operands = 0 : i64, tpu.core_type = #tpu.core_type<tc>, window_params = [{transform_indices = @transform_0, window_bounds = array<i64: 8, 32>}, {pipeline_mode = #tpu.pipeline_mode<synchronous>, transform_indices = @transform_1, window_bounds = array<i64: 128, 32>}, {pipeline_mode = #tpu.pipeline_mode<synchronous>, transform_indices = @transform_2, window_bounds = array<i64: 1, 128>}, {transform_indices = @transform_3, window_bounds = array<i64: 8, 128>}]} {
    %c0 = arith.constant 0 : index
    %c0_0 = arith.constant 0 : index
    %0 = vector.load %arg1[%c0, %c0_0] : memref<8x32xf32, #tpu.memory_space<vmem>>, vector<8x32xf32>
    %c0_1 = arith.constant 0 : index
    %c0_2 = arith.constant 0 : index
    %1 = vector.load %arg2[%c0_1, %c0_2] : memref<128x32xf32, #tpu.memory_space<vmem>>, vector<128x32xf32>
    %cst = arith.constant dense<0.000000e+00> : vector<8x128xf32>
    %2 = tpu.matmul %0, %1, %cst {dimension_numbers = #tpu.dot_dimension_numbers<[1], [1], [0], [0], [0, 0, 1, 0], [], []>} : vector<8x32xf32>, vector<128x32xf32>, vector<8x128xf32> -> vector<8x128xf32>
    %c0_3 = arith.constant 0 : index
    %c0_4 = arith.constant 0 : index
    %3 = vector.load %arg3[%c0_3, %c0_4] : memref<1x128xf32, #tpu.memory_space<vmem>>, vector<1x128xf32>
    %4 = vector.broadcast %3 : vector<1x128xf32> to vector<8x128xf32>
    %5 = arith.addf %2, %4 : vector<8x128xf32>
    %c0_5 = arith.constant 0 : index
    %c0_6 = arith.constant 0 : index
    %6 = vector.load %arg4[%c0_5, %c0_6] : memref<8x128xf32, #tpu.memory_space<vmem>>, vector<8x128xf32>
    tpu.vector_store %arg4[%c0_5, %c0_6], %5 {strides = array<i32>} : memref<8x128xf32, #tpu.memory_space<vmem>>, vector<8x128xf32>,
    return
  }
  func.func @transform_0(%arg0: i32) -> (i32, i32) {
    %c0_i32 = arith.constant 0 : i32
    %c0_i32_0 = arith.constant 0 : i32
    return %arg0, %c0_i32 : i32, i32
  }
  func.func @transform_1(%arg0: i32) -> (i32, i32) {
    %c0_i32 = arith.constant 0 : i32
    %c0_i32_0 = arith.constant 0 : i32
    %c0_i32_1 = arith.constant 0 : i32
    return %c0_i32, %c0_i32_0 : i32, i32
  }
  func.func @transform_2(%arg0: i32) -> (i32, i32) {
    %c0_i32 = arith.constant 0 : i32
    %c0_i32_0 = arith.constant 0 : i32
    %c0_i32_1 = arith.constant 0 : i32
    return %c0_i32, %c0_i32_0 : i32, i32
  }
  func.func @transform_3(%arg0: i32) -> (i32, i32) {
    %c0_i32 = arith.constant 0 : i32
    %c0_i32_0 = arith.constant 0 : i32
    return %arg0, %c0_i32 : i32, i32
  }
}

</mosaic_0001>

<bundles_post_ra>
// kernel: tpu_custom_call.1
= control target key start
LH: loop header
LB: loop body
LE: loop exit
PB: predicated region body
PF: predicated region fallthrough
CT: control target
= control target key end

     0   :  { %vm39_vm0 = vcmask 261120   ;;  %v271_v1 = vmov 0.0   ;;  %vm272_vm1 = vmmov 0   ;;  %s368_s0 = inlined_call_operand.vmem [shape: f32[8,32], index: 0, kind: input, shape index: {}]   ;;  %s369_s1 = inlined_call_operand.vmem [shape: f32[128,32], index: 1, kind: input, shape index: {}]   ;;  %s370_s2 = inlined_call_operand.vmem [shape: f32[1,128], index: 2, kind: input, shape index: {}]   ;;  %s371_s3 = inlined_call_operand.hbm [shape: f32[8,128], index: 3, kind: output, shape index: {}]  }
   0x1   :  { %v31_v0 = vld [vmem:[%s369_s1 + $0x78] sm:$0xff]  ;;  %211 = vmatprep.subr.mxu0 %v271_v1  ;;  %243 = vmatprep.mubr.msk.f32.mxu0 %vm272_vm1, %v271_v1  ;;  %v30_v2 = vld [vmem:[%s369_s1 + $0x70] sm:$0xff] }
   0x2   :  { %212 = vmatpush3.xpose.msk.msra.mxu0 %vm39_vm0, %v31_v0 }
   0x3   :  { %213 = vmatprep.subr.mxu0 %v271_v1 }
   0x6   :  { %214 = vmatpush3.xpose.msk.msra.mxu0 %vm39_vm0, %v30_v2 }
   0x7   :  { %8 = vsyncpa [#allocation3], 0  ;;  %215 = vmatprep.subr.mxu0 %v271_v1  ;;  %v29_v3 = vld [vmem:[%s369_s1 + $0x68] sm:$0xff]  ;;  %v28_v4 = vld [vmem:[%s369_s1 + $0x60] sm:$0xff]  ;;  %s273_s21 = smov [#allocation2]  }
   0x8   :  { %v27_v5 = vld [vmem:[%s369_s1 + $0x58] sm:$0xff]  ;;  %v26_v6 = vld [vmem:[%s369_s1 + $0x50] sm:$0xff]  ;;  %v25_v7 = vld [vmem:[%s369_s1 + $0x48] sm:$0xff]  ;;  %s168_s22 = sshll.u32 %s273_s21, 4  ;;  %s169_s22 = int_to_ptr.vmem [resolvable:$true] %s168_s22 }
   0x9   :  { %v24_v8 = vld [vmem:[%s369_s1 + $0x40] sm:$0xff]  ;;  %v23_v9 = vld [vmem:[%s369_s1 + $0x38] sm:$0xff]  ;;  %v22_v10 = vld [vmem:[%s369_s1 + $0x30] sm:$0xff]  ;;  %p254_p1 = scmp.lt.s32.totalorder %s169_s22, %s169_s22 }
   0xa   :  { %216 = vmatpush3.xpose.msk.msra.mxu0 %vm39_vm0, %v29_v3  ;;  %v21_v11 = vld [vmem:[%s369_s1 + $0x28] sm:$0xff]  ;;  %v20_v12 = vld [vmem:[%s369_s1 + $0x20] sm:$0xff]  ;;  %v19_v13 = vld [vmem:[%s369_s1 + $0x18] sm:$0xff] }
   0xb   :  { %217 = vmatprep.subr.mxu0 %v271_v1  ;;  %v18_v14 = vld [vmem:[%s369_s1 + $0x10] sm:$0xff]  ;;  %v17_v15 = vld [vmem:[%s369_s1 + $0x8] sm:$0xff]  ;;  %v16_v16 = vld [vmem:[%s369_s1] sm:$0xff]  ;;  %s249_s1 = scalar_lea.vmem %s169_s22, 128 }
   0xc   :  { %v15_v17 = vld [vmem:[%s368_s0] sm:$0xff]  ;;  %p250_p0 = scmp.ne.s32.totalorder %s169_s22, %s249_s1  ;;  %p255_p2 = scmp.lt.s32.totalorder %s249_s1, %s249_s1 }
   0xd   :  { %v176_v18 = vld [vmem:[%s370_s2] ss:$0 sm:$0xff] }
   0xe   :  { %218 = vmatpush3.xpose.msk.msra.mxu0 %vm39_vm0, %v28_v4  ;;  %p256_p3 = por %p255_p2, %p254_p1 }
   0xf   :  { %219 = vmatprep.subr.mxu0 %v271_v1 }
  0x10   :  { %p257_p4 = pnand %p256_p3, %p250_p0 }
  0x12   :  { %220 = vmatpush3.xpose.msk.msra.mxu0 %vm39_vm0, %v27_v5 }
  0x13   :  { %221 = vmatprep.subr.mxu0 %v271_v1 }
  0x16   :  { %222 = vmatpush3.xpose.msk.msra.mxu0 %vm39_vm0, %v26_v6 }
  0x17   :  { %223 = vmatprep.subr.mxu0 %v271_v1 }
  0x1a   :  { %224 = vmatpush3.xpose.msk.msra.mxu0 %vm39_vm0, %v25_v7 }
  0x1b   :  { %225 = vmatprep.subr.mxu0 %v271_v1 }
  0x1e   :  { %226 = vmatpush3.xpose.msk.msra.mxu0 %vm39_vm0, %v24_v8 }
  0x1f   :  { %227 = vmatprep.subr.mxu0 %v271_v1 }
  0x22   :  { %228 = vmatpush3.xpose.msk.msra.mxu0 %vm39_vm0, %v23_v9 }
  0x23   :  { %229 = vmatprep.subr.mxu0 %v271_v1 }
  0x26   :  { %230 = vmatpush3.xpose.msk.msra.mxu0 %vm39_vm0, %v22_v10 }
  0x27   :  { %231 = vmatprep.subr.mxu0 %v271_v1 }
  0x2a   :  { %232 = vmatpush3.xpose.msk.msra.mxu0 %vm39_vm0, %v21_v11 }
  0x2b   :  { %233 = vmatprep.subr.mxu0 %v271_v1 }
  0x2e   :  { %234 = vmatpush3.xpose.msk.msra.mxu0 %vm39_vm0, %v20_v12 }
  0x2f   :  { %235 = vmatprep.subr.mxu0 %v271_v1 }
  0x32   :  { %236 = vmatpush3.xpose.msk.msra.mxu0 %vm39_vm0, %v19_v13 }
  0x33   :  { %237 = vmatprep.subr.mxu0 %v271_v1 }
  0x36   :  { %238 = vmatpush3.xpose.msk.msra.mxu0 %vm39_vm0, %v18_v14 }
  0x37   :  { %239 = vmatprep.subr.mxu0 %v271_v1 }
  0x3a   :  { %240 = vmatpush3.xpose.msk.msra.mxu0 %vm39_vm0, %v17_v15 }
  0x3b   :  { %241 = vmatprep.subr.mxu0 %v271_v1 }
  0x3e   :  { %242 = vmatpush3.xpose.msk.msra.mxu0 %vm39_vm0, %v16_v16 }
  0x41   :  { %244 = vmatmul.mubr.msk.f32.vlgmr.msra.gmra.mxu0 %vm39_vm0, %v15_v17 }
 0x101   :  { %v157_v19 = vpop.f32.mrf.mxu0 }
 0x102   :  { %v158_v20 = vadd.f32 %v176_v18, %v157_v19 }
 0x103   :  { %v245_v21 = vpop.f32.mrf.mxu0 }
 0x104   :  { %161 = vst [vmem:[#allocation2] sm:$0xff] %v158_v20 }
 0x105   :  { %260 = shalt.err (!%p257_p4)
}
 0x106   :  { %171 = dma.vmem_to_hbm [thread:$0]  %s169_s22, 128, %s371_s3, [#allocation3]  }
 0x107   :  { %269 = dma.done.wait [#allocation3], 128  }
 0x108   :  { %270 = vsyncadd [#allocation3], 4294967168 }
 0x109   :  { %175 = vsyncpa [#allocation3], 1 }

</bundles_post_ra>
